<compile_context>
chip_gen: v5e
topology: v5e:2x2
jax: 0.10.0
libtpu: 0.0.40
codegen_flags: <defaults>
</compile_context>

<pallas_src>
import jax
import jax.numpy as jnp
from jax.experimental import pallas as pl
from jax.experimental.pallas import tpu as pltpu

# Below this many bytes a plain XLA copy beats a kernel launch by a wide margin.
_SMALL_COPY_BYTES = 1 << 20  # 1 MiB


def _hbm_copy_kernel(src_ref, dst_ref, sem):
    """Whole-array HBM->HBM copy: one DMA, no VMEM staging, no vector slots."""
    cp = pltpu.make_async_copy(src_ref, dst_ref, sem)
    cp.start()
    cp.wait()


def _pallas_hbm_copy(x: jax.Array) -> jax.Array:
    """Materialize a distinct copy of `x` with a single HBM->HBM DMA."""
    return pl.pallas_call(
        _hbm_copy_kernel,
        out_shape=jax.ShapeDtypeStruct(x.shape, x.dtype),
        in_specs=[pl.BlockSpec(memory_space=pl.ANY)],   # raw HBM ref, no auto-DMA tiling
        out_specs=pl.BlockSpec(memory_space=pl.ANY),    # raw HBM ref, written by the DMA
        scratch_shapes=[pltpu.SemaphoreType.DMA],       # DMA completion semaphore
    )(x)


def drift_network_forward(A: jax.Array, *, materialize: bool = False,
                          force_pallas: bool = False) -> jax.Array:
    """Pallas equivalent of DriftNetwork.forward(): returns A.

    materialize=False (default): zero-cost -- return the parameter itself.
    materialize=True: return a *separate* buffer holding A's values.  Small
    arrays use a plain XLA copy (kernel-launch overhead would dominate); large
    ones use a single HBM->HBM Pallas DMA that stays at the HBM copy roofline.
    """
    if not materialize:
        # forward() is a pure identity; this is the path real callers should use.
        return A
    nbytes = A.size * jnp.dtype(A.dtype).itemsize
    if nbytes < _SMALL_COPY_BYTES and not force_pallas:
        return jnp.copy(A)
    return _pallas_hbm_copy(A)


def init_drift_network_params(key, d: int, init_scale: float = 0.01):
    """Deterministic parameter init matching: A = init_scale * randn(d, d)."""
    A = init_scale * jax.random.normal(key, (d, d), dtype=jnp.float32)
    return {"A": A}


if __name__ == "__main__":
    d = 32  # small synthetic size consistent with the module
    key = jax.random.PRNGKey(0)
    params = init_drift_network_params(key, d, init_scale=0.01)
    A = params["A"]

    # 1) Default forward: zero-cost identity (the recommended path).
    out_default = drift_network_forward(A)
    assert out_default is A

    # 2) Materialized copy via the Pallas HBM->HBM DMA kernel (forced so the
    #    kernel actually compiles and runs at this small demo size).
    out_copy = drift_network_forward(A, materialize=True, force_pallas=True)
    out_copy = jax.block_until_ready(out_copy)
    assert out_copy.shape == (d, d)
    assert out_copy.dtype == A.dtype
    assert bool(jnp.allclose(out_copy, A))

    # 3) Small-array materialize path without force: plain XLA copy, no kernel.
    out_small = jax.block_until_ready(drift_network_forward(A, materialize=True))
    assert bool(jnp.allclose(out_small, A))

    print("KERNEL_OK")
</pallas_src>

<mosaic_0001>
module attributes {stable_mosaic.version = 11 : i64} {
  func.func @_hbm_copy_kernel(%arg0: memref<32x32xf32, #tpu.memory_space<any>>, %arg1: memref<32x32xf32, #tpu.memory_space<any>>, %arg2: memref<!tpu.dma_semaphore, #tpu.memory_space<semaphore_mem>>) attributes {dimension_semantics = [], scalar_prefetch = 0 : i64, scratch_operands = 1 : i64, tpu.core_type = #tpu.core_type<tc>} {
    tpu.enqueue_dma source(%arg0 : memref<32x32xf32, #tpu.memory_space<any>>) target(%arg1 : memref<32x32xf32, #tpu.memory_space<any>>) target_semaphore(%arg2 : memref<!tpu.dma_semaphore, #tpu.memory_space<semaphore_mem>>)
    tpu.wait_dma2 semaphore(%arg2 : memref<!tpu.dma_semaphore, #tpu.memory_space<semaphore_mem>>) src(%arg0 : memref<32x32xf32, #tpu.memory_space<any>>) dst(%arg1 : memref<32x32xf32, #tpu.memory_space<any>>)
    return
  }
}

</mosaic_0001>

<bundles_post_ra>
// kernel: tpu_custom_call.1
= control target key start
LH: loop header
LB: loop body
LE: loop exit
PB: predicated region body
PF: predicated region fallthrough
CT: control target
= control target key end

     0   :  { %s32_s12 = smov [#allocation2]   ;;  %s33_s13 = smov [#allocation3]   ;;  %s51_s0 = inlined_call_operand.hbm [shape: f32[32,32], index: 0, kind: input, shape index: {}]   ;;  %s52_s1 = inlined_call_operand.hbm [shape: f32[32,32], index: 1, kind: output, shape index: {}]  }
   0x1   :  { %s10_s8 = sshll.u32 %s51_s0, 4  ;;  %s12_s11 = sshll.u32 %s52_s1, 4  ;;  %s11_s8 = int_to_ptr.hbm [resolvable:$true] %s10_s8  ;;  %s13_s11 = int_to_ptr.hbm [resolvable:$true] %s12_s11 }
   0x2   :  { %s34_s14 = smov 0  }
   0x3   :  { %16 = dma.general %s11_s8, 512, %s13_s11, %s32_s12, %s33_s13, [#allocation4], %s34_s14, 0  }
   0x4   :  { %30 = dma.done.wait [#allocation2], 512 }
   0x5   :  { %31 = vsyncadd [#allocation2], 4294966784 }
   0x6   :  { %20 = vsyncmov [#allocation2] }
   0x9   :  { %s21_s15 = vpop.sfrf %20 }
   0xa   :  { %p26_p0 = scmp.ne.s32.totalorder %s21_s15, 0 }
   0xc   :  { %25 = shalt.err (%p26_p0)  }

</bundles_post_ra>
